<compile_context>
chip_gen: v6e
topology: v6e:2x2x1
jax: 0.10.0
libtpu: 0.0.40
codegen_flags: <defaults>
</compile_context>

<pallas_src>
import jax
import jax.numpy as jnp
from jax.experimental import pallas as pl
from jax.experimental.pallas import tpu as pltpu


def _round_up(x, m):
    return ((x + m - 1) // m) * m


def _make_kernel(nb):
    def kernel(x_ref, w_ref, s1_ref, b1_ref, b2_ref, o_ref):
        # x_ref : (nb, Cin, t)  activations: channels on sublanes, spatial on lanes
        # w_ref : (Cout, Cin)   conv weight with BN2 scale pre-folded
        # s1/b1 : (Cin, 1)      folded BN1 scale / bias (broadcast over lanes)
        # b2    : (Cout, 1)     folded BN2 bias
        # o_ref : (nb, Cout, t)
        w = w_ref[...]
        s1 = s1_ref[...]
        b1 = b1_ref[...]
        b2 = b2_ref[...]
        for b in range(nb):  # static unroll over the (small) batch tile
            h = jnp.maximum(x_ref[b] * s1 + b1, 0.0)          # BN1 + ReLU
            y = jnp.dot(w, h, preferred_element_type=jnp.float32)  # (Cout, t) on MXU
            o_ref[b] = (y + b2).astype(o_ref.dtype)           # + BN2 bias

    return kernel


def fused_bn_relu_conv_bn(x_nchw, conv_w, bn1, bn2, *, thw=8192,
                          target_bytes=2 << 20):
    """x_nchw: (N, Cin, H, W) f32. conv_w: (Cout, Cin) f32 (1x1 conv squeezed).
    bn1/bn2: dicts with gamma, beta, mean, var, eps. Returns (N, Cout, H, W) f32."""
    N, Cin, H, W = x_nchw.shape
    Cout = conv_w.shape[0]
    HW = H * W

    # Fold BN params (inference mode: running stats).
    s1 = bn1["gamma"] * jax.lax.rsqrt(bn1["var"] + bn1["eps"])
    b1 = bn1["beta"] - bn1["mean"] * s1
    s2 = bn2["gamma"] * jax.lax.rsqrt(bn2["var"] + bn2["eps"])
    b2 = bn2["beta"] - bn2["mean"] * s2
    w_s = conv_w * s2[:, None]          # fold BN2 scale into the conv weight

    # NCHW kept as-is: (N, Cin, H*W) is a free reshape (no transpose, no copy).
    x3 = x_nchw.reshape(N, Cin, HW)

    # ---- Tile selection -----------------------------------------------------
    # Spatial (lane) tile: multiple of 128, capped at `thw`.  A ragged final
    # tile is handled by Pallas (OOB output lanes dropped; garbage input lanes
    # only affect those dropped lanes -- no cross-lane reduction over t here).
    hw_up = _round_up(HW, 128)
    t = min(_round_up(thw, 128), hw_up)

    per_elem = Cin * t * 4              # activation bytes / batch element / tile
    nb = 1
    if t >= hw_up:
        # Small feature map: one spatial tile covers all of HW, so pack several
        # batch elements per grid step to keep per-step DMA in the MiB range.
        nb = max(1, min(N, target_bytes // max(per_elem, 1)))

    # Keep at least 2 total grid steps when the problem allows it (v7x has
    # 2 TensorCores; a 1-step grid forfeits half the chip).
    if nb >= N and N >= 2 and pl.cdiv(HW, t) < 2:
        nb = (N + 1) // 2
    elif N == 1 and pl.cdiv(HW, t) < 2 and hw_up >= 256:
        t = _round_up(hw_up // 2, 128)

    grid = (pl.cdiv(N, nb), pl.cdiv(HW, t))

    # ---- VMEM budget / cost hint -------------------------------------------
    vmem_need = 2 * nb * (Cin + Cout) * t * 4 \
        + 4 * (Cout * Cin + 2 * Cin + 2 * Cout)      # double-buffered act + params
    vmem_limit = int(min(48 << 20, max(32 << 20, 2 * vmem_need)))

    cost = pl.CostEstimate(
        flops=2 * N * HW * Cin * Cout,
        transcendentals=0,
        bytes_accessed=4 * (N * HW * (Cin + Cout) + Cout * Cin + 2 * Cin + 2 * Cout),
    )

    out = pl.pallas_call(
        _make_kernel(nb),
        out_shape=jax.ShapeDtypeStruct((N, Cout, HW), jnp.float32),
        grid_spec=pltpu.PrefetchScalarGridSpec(
            num_scalar_prefetch=0,
            grid=grid,
            in_specs=[
                pl.BlockSpec((nb, Cin, t), lambda n, j: (n, 0, j)),
                pl.BlockSpec((Cout, Cin), lambda n, j: (0, 0)),
                pl.BlockSpec((Cin, 1), lambda n, j: (0, 0)),
                pl.BlockSpec((Cin, 1), lambda n, j: (0, 0)),
                pl.BlockSpec((Cout, 1), lambda n, j: (0, 0)),
            ],
            out_specs=pl.BlockSpec((nb, Cout, t), lambda n, j: (n, 0, j)),
        ),
        compiler_params=pltpu.CompilerParams(
            dimension_semantics=("parallel", "parallel"),
            vmem_limit_bytes=vmem_limit),
        cost_estimate=cost,
    )(x3, w_s, s1.reshape(Cin, 1), b1.reshape(Cin, 1), b2.reshape(Cout, 1))

    return out.reshape(N, Cout, H, W)   # free reshape, output stays NCHW


def _reference(x_nchw, conv_w, bn1, bn2):
    s1 = bn1["gamma"] * jax.lax.rsqrt(bn1["var"] + bn1["eps"])
    b1 = bn1["beta"] - bn1["mean"] * s1
    s2 = bn2["gamma"] * jax.lax.rsqrt(bn2["var"] + bn2["eps"])
    b2 = bn2["beta"] - bn2["mean"] * s2
    h = jnp.maximum(x_nchw * s1[None, :, None, None] + b1[None, :, None, None], 0.0)
    # BN2 in eval mode: s2*conv(h) + b2 == conv_{w*s2}(h) + b2 (exact folding).
    w_s = conv_w * s2[:, None]
    y = jnp.einsum("nchw,oc->nohw", h, w_s)
    return y + b2[None, :, None, None]


def _make_bn(keys, C, eps):
    kg, kb, km, kv = keys
    return dict(
        gamma=1.0 + 0.1 * jax.random.normal(kg, (C,), jnp.float32),
        beta=0.1 * jax.random.normal(kb, (C,), jnp.float32),
        mean=0.1 * jax.random.normal(km, (C,), jnp.float32),
        var=1.0 + 0.1 * jax.random.uniform(kv, (C,), jnp.float32),
        eps=eps,
    )


if __name__ == "__main__":
    key = jax.random.PRNGKey(0)
    keys = jax.random.split(key, 11)

    # Cin=72 / Cout=24 are fixed by the module; reduced batch/spatial for test 1.
    Cin, Cout, eps = 72, 24, 1e-5
    conv_w = jax.random.normal(keys[0], (Cout, Cin), dtype=jnp.float32) * 0.1
    bn1 = _make_bn(keys[1:5], Cin, eps)
    bn2 = _make_bn(keys[5:9], Cout, eps)

    # Test 1: small shape, exercises the batch-tiled path.
    x_small = jax.random.normal(keys[9], (2, Cin, 16, 16), dtype=jnp.float32)
    out = jax.block_until_ready(fused_bn_relu_conv_bn(x_small, conv_w, bn1, bn2))
    ref = _reference(x_small, conv_w, bn1, bn2)
    assert out.shape == ref.shape, out.shape
    assert jnp.allclose(out, ref, atol=1e-3, rtol=1e-3), \
        float(jnp.max(jnp.abs(out - ref)))

    # Test 2: the module's native spatial size (1, 72, 56, 56) -- exercises the
    # spatial-tiled path with a ragged final lane tile (HW=3136).
    x_full = jax.random.normal(keys[10], (1, Cin, 56, 56), dtype=jnp.float32)
    out2 = jax.block_until_ready(fused_bn_relu_conv_bn(x_full, conv_w, bn1, bn2))
    ref2 = _reference(x_full, conv_w, bn1, bn2)
    assert out2.shape == ref2.shape, out2.shape
    assert jnp.allclose(out2, ref2, atol=1e-3, rtol=1e-3), \
        float(jnp.max(jnp.abs(out2 - ref2)))

    print("KERNEL_OK")
</pallas_src>

<mosaic_0001>
module attributes {stable_mosaic.version = 11 : i64} {
  func.func @kernel(%arg0: i32, %arg1: i32, %arg2: memref<1x72x256xf32, #tpu.memory_space<vmem>>, %arg3: memref<24x72xf32, #tpu.memory_space<vmem>>, %arg4: memref<72x1xf32, #tpu.memory_space<vmem>>, %arg5: memref<72x1xf32, #tpu.memory_space<vmem>>, %arg6: memref<24x1xf32, #tpu.memory_space<vmem>>, %arg7: memref<1x24x256xf32, #tpu.memory_space<vmem>>) attributes {dimension_semantics = [#tpu.dimension_semantics<parallel>, #tpu.dimension_semantics<parallel>], iteration_bounds = array<i64: 2, 1>, scalar_prefetch = 0 : i64, scratch_operands = 0 : i64, tpu.core_type = #tpu.core_type<tc>, window_params = [{transform_indices = @transform_0, window_bounds = array<i64: 1, 72, 256>}, {pipeline_mode = #tpu.pipeline_mode<synchronous>, transform_indices = @transform_1, window_bounds = array<i64: 24, 72>}, {pipeline_mode = #tpu.pipeline_mode<synchronous>, transform_indices = @transform_2, window_bounds = array<i64: 72, 1>}, {pipeline_mode = #tpu.pipeline_mode<synchronous>, transform_indices = @transform_3, window_bounds = array<i64: 72, 1>}, {pipeline_mode = #tpu.pipeline_mode<synchronous>, transform_indices = @transform_4, window_bounds = array<i64: 24, 1>}, {transform_indices = @transform_5, window_bounds = array<i64: 1, 24, 256>}]} {
    %c0 = arith.constant 0 : index
    %c0_0 = arith.constant 0 : index
    %0 = vector.load %arg3[%c0, %c0_0] : memref<24x72xf32, #tpu.memory_space<vmem>>, vector<24x72xf32>
    %c0_1 = arith.constant 0 : index
    %c0_2 = arith.constant 0 : index
    %1 = vector.load %arg4[%c0_1, %c0_2] : memref<72x1xf32, #tpu.memory_space<vmem>>, vector<72x1xf32>
    %c0_3 = arith.constant 0 : index
    %c0_4 = arith.constant 0 : index
    %2 = vector.load %arg5[%c0_3, %c0_4] : memref<72x1xf32, #tpu.memory_space<vmem>>, vector<72x1xf32>
    %c0_5 = arith.constant 0 : index
    %c0_6 = arith.constant 0 : index
    %3 = vector.load %arg6[%c0_5, %c0_6] : memref<24x1xf32, #tpu.memory_space<vmem>>, vector<24x1xf32>
    %c0_7 = arith.constant 0 : index
    %c0_8 = arith.constant 0 : index
    %c0_9 = arith.constant 0 : index
    %4 = vector.load %arg2[%c0_7, %c0_8, %c0_9] : memref<1x72x256xf32, #tpu.memory_space<vmem>>, vector<1x72x256xf32>
    %5 = vector.shape_cast %4 : vector<1x72x256xf32> to vector<72x256xf32>
    %6 = vector.broadcast %1 : vector<72x1xf32> to vector<72x256xf32>
    %7 = arith.mulf %5, %6 : vector<72x256xf32>
    %8 = vector.broadcast %2 : vector<72x1xf32> to vector<72x256xf32>
    %9 = arith.addf %7, %8 : vector<72x256xf32>
    %cst = arith.constant 0.000000e+00 : f32
    %10 = vector.broadcast %cst : f32 to vector<72x256xf32>
    %11 = arith.maximumf %9, %10 : vector<72x256xf32>
    %cst_10 = arith.constant dense<0.000000e+00> : vector<24x256xf32>
    %12 = tpu.matmul %0, %11, %cst_10 {dimension_numbers = #tpu.dot_dimension_numbers<[1], [0], [0], [1], [0, 0, 1, 1], [], []>} : vector<24x72xf32>, vector<72x256xf32>, vector<24x256xf32> -> vector<24x256xf32>
    %13 = vector.broadcast %3 : vector<24x1xf32> to vector<24x256xf32>
    %14 = arith.addf %12, %13 : vector<24x256xf32>
    %c0_11 = arith.constant 0 : index
    %c0_12 = arith.constant 0 : index
    %c0_13 = arith.constant 0 : index
    %15 = vector.load %arg7[%c0_11, %c0_12, %c0_13] : memref<1x24x256xf32, #tpu.memory_space<vmem>>, vector<1x24x256xf32>
    %16 = vector.shape_cast %15 : vector<1x24x256xf32> to vector<24x256xf32>
    %17 = vector.shape_cast %14 : vector<24x256xf32> to vector<1x24x256xf32>
    tpu.vector_store %arg7[%c0_11, %c0_12, %c0_13], %17 {strides = array<i32>} : memref<1x24x256xf32, #tpu.memory_space<vmem>>, vector<1x24x256xf32>,
    return
  }
  func.func @transform_0(%arg0: i32, %arg1: i32) -> (i32, i32, i32) {
    %c0_i32 = arith.constant 0 : i32
    %c0_i32_0 = arith.constant 0 : i32
    return %arg0, %c0_i32, %arg1 : i32, i32, i32
  }
  func.func @transform_1(%arg0: i32, %arg1: i32) -> (i32, i32) {
    %c0_i32 = arith.constant 0 : i32
    %c0_i32_0 = arith.constant 0 : i32
    %c0_i32_1 = arith.constant 0 : i32
    return %c0_i32, %c0_i32_0 : i32, i32
  }
  func.func @transform_2(%arg0: i32, %arg1: i32) -> (i32, i32) {
    %c0_i32 = arith.constant 0 : i32
    %c0_i32_0 = arith.constant 0 : i32
    %c0_i32_1 = arith.constant 0 : i32
    return %c0_i32, %c0_i32_0 : i32, i32
  }
  func.func @transform_3(%arg0: i32, %arg1: i32) -> (i32, i32) {
    %c0_i32 = arith.constant 0 : i32
    %c0_i32_0 = arith.constant 0 : i32
    %c0_i32_1 = arith.constant 0 : i32
    return %c0_i32, %c0_i32_0 : i32, i32
  }
  func.func @transform_4(%arg0: i32, %arg1: i32) -> (i32, i32) {
    %c0_i32 = arith.constant 0 : i32
    %c0_i32_0 = arith.constant 0 : i32
    %c0_i32_1 = arith.constant 0 : i32
    return %c0_i32, %c0_i32_0 : i32, i32
  }
  func.func @transform_5(%arg0: i32, %arg1: i32) -> (i32, i32, i32) {
    %c0_i32 = arith.constant 0 : i32
    %c0_i32_0 = arith.constant 0 : i32
    return %arg0, %c0_i32, %arg1 : i32, i32, i32
  }
}

</mosaic_0001>

<bundles_post_ra>
// kernel: tpu_custom_call.1
= control target key start
LH: loop header
LB: loop body
LE: loop exit
PB: predicated region body
PF: predicated region fallthrough
CT: control target
= control target key end

     0   :  { %10 = vsyncpa [#allocation3], 0  ;;  %s1161_s0 = inlined_call_operand.hbm [shape: f32[2,72,256], index: 0, kind: input, shape index: {}]   ;;  %s1162_s1 = inlined_call_operand.vmem [shape: f32[24,72], index: 1, kind: input, shape index: {}]   ;;  %s1163_s2 = inlined_call_operand.vmem [shape: f32[72,1], index: 2, kind: input, shape index: {}]   ;;  %s1164_s3 = inlined_call_operand.vmem [shape: f32[72,1], index: 3, kind: input, shape index: {}]   ;;  %s1165_s4 = inlined_call_operand.vmem [shape: f32[24,1], index: 4, kind: input, shape index: {}]   ;;  %s1166_s5 = inlined_call_operand.hbm [shape: f32[2,24,256], index: 5, kind: output, shape index: {}]  }
   0x1   :  { %12 = vsyncpa [#allocation3 + $0x1], 0 }
   0x2   :  { %13 = vsyncpa [#allocation4], 0 }
   0x3   :  { %15 = vsyncpa [#allocation4 + $0x1], 0  ;;  %s919_s18 = smov 0   ;;  %s921_s19 = smov 0  }
   0x4   :  { %s923_s20 = smov 0   ;;  %s925_s21 = smov 0  }
   0x5   :  { %s927_s22 = smov 0   ;;  %s929_s23 = smov 0  }
   0x6 LB: > { %s666_s24 = sadd.s32 4294967295, %s879_s23   ;;  %s667_s25 = sadd.s32 4294967294, %s879_s23   ;;  %s879_s23 = sphi %s929_s23, %s21_s23   ;;  %s875_s22 = sphi %s927_s22, %s1177_s22   ;;  %s871_s21 = sphi %s925_s21, %s1176_s21   ;;  %s867_s20 = sphi %s923_s20, %s1175_s20   ;;  %s863_s19 = sphi %s921_s19, %s1174_s19   ;;  %s859_s18 = sphi %s919_s18, %s1173_s18  }
   0x7   : > { %s33_s26 = sadd.s32 1, %s875_s22  ;;  %s42_s27 = sadd.s32 1, %s867_s20 }
   0x8   : > { %p35_p0 = scmp.ge.s32.totalorder %s33_s26, 2  ;;  %p49_p1 = scmp.ne.s32.totalorder %s867_s20, %s863_s19 }
   0x9   : > { %p50_p2 = scmp.eq.s32.totalorder %s879_s23, 0  ;;  %p55_p3 = scmp.ne.s32.totalorder %s863_s19, %s859_s18 }
   0xa   : > { %s1179_s26 = smov (%p35_p0, %s33_s26), 0  ;;  %p56_p5 = scmp.eq.s32.totalorder %s666_s24, 0 }
   0xb   : > { %p960_p4 = por %p50_p2, %p49_p1  ;;  %s37_s29 = ssub.s32 %s875_s22, %s1179_s26 }
   0xc   : > { %p165_p6 = scmp.eq.s32.totalorder %s666_s24, 1  ;;  %p40_p7 = scmp.eq.s32.totalorder %s37_s29, 0 }
   0xd   : > { %p966_p8 = por %p56_p5, %p55_p3  ;;  %p171_p10 = scmp.eq.s32.totalorder %s667_s25, 1 }
   0xe   : > { %p970_p9 = por %p165_p6, %p49_p1  ;;  %p713_p13 = scmp.lt.s32.totalorder %s879_s23, 2 }
   0xf   : > { %s975_s7 = scalar_select %p40_p7, %s867_s20, %s42_s27  }
  0x10   : > { %p977_p11 = por %p171_p10, %p55_p3  ;;  %s203_s9 = sand.u32 1, %s867_s20  }
  0x11   : > { %s696_s10 = smul.u32 144, %s203_s9  ;;  %p987_p0 = pnand %p713_p13, %p960_p4 }
  0x12   : > { %s697_s11 = smul.u32 2304, %s875_s22  ;;  %p671_p1 = scmp.ge.s32.totalorder %s879_s23, 1 }
  0x13   : > { %s207_s16 = scalar_lea.vmem [#allocation2], %s696_s10  ;;  %s204_s24 = scalar_lea.sflag [#allocation3], %s203_s9 }
  0x14   : > { %s215_s15 = scalar_lea.hbm %s1161_s0, %s697_s11  ;;  %s216_s17 = sshll.u32 %s207_s16, 4  ;;  %s217_s17 = int_to_ptr.vmem [resolvable:$true] %s216_s17 }
  0x15   : > { %p773_p2 = pneg %p987_p0  ;;  %s784_s25 = scalar_lea.vmem %s217_s17, 2304 }
  0x16   : > { %p785_p3 = scmp.ne.s32.totalorder %s217_s17, %s784_s25  ;;  %s881_s27 = smov [#allocation2]  }
  0x17   : > { %s789_s28 = sshll.u32 %s881_s27, 4  ;;  %s790_s28 = int_to_ptr.vmem [resolvable:$false] %s789_s28 }
  0x18   : > { %p787_p5 = pnand %p785_p3, %p773_p2  ;;  %s791_s29 = scalar_lea.vmem %s790_s28, 4608 }
  0x19   : > { %p792_p4 = scmp.lt.s32.totalorder %s217_s17, %s790_s28  ;;  %p793_p7 = scmp.lt.s32.totalorder %s791_s29, %s784_s25 }
  0x1a   : > { %p788_p6 = pneg %p787_p5 }
  0x1b   : > { %p794_p10 = por %p793_p7, %p792_p4 }
  0x1d   : > { %p795_p13 = pnand %p794_p10, %p788_p6 }
  0x1f   : > { %798 = shalt.err (!%p795_p13)
}
  0x20   : > { %s882_s10 = smov 256   ;;  %s883_s9 = smov 16  }
  0x21   : > { %708 = dma.hbm_to_vmem [thread:$0]  (!%p987_p0), %s215_s15, 2304, %s217_s17, %s204_s24, %s882_s10, %s882_s10, %s883_s9  }
  0x22   : > { %p224_p12 = scmp.lt.s32.totalorder %s879_s23, 3 }
  0x24   : > { %p225_p2 = pnand %p671_p1, %p224_p12 }
  0x25   : > { %s1003_s11 = sand.u32 (!%p225_p2), 1, %s863_s19  }
  0x26   : > { %228 = sbr.rel (%p225_p2) target bundleno = 425 (0x1a9), region = 40  ;;  %s231_s14 = scalar_lea.sflag (!%p225_p2), [#allocation3], %s1003_s11 }
  0x27   : > { %s698_s13 = smul.u32 (!%p225_p2), 144, %s1003_s11 }
  0x29   : > { %s1007_s16 = scalar_lea.vmem (!%p225_p2), [#allocation2], %s698_s13 }
  0x2b   : > { %850 = dma.done.wait (%p966_p8), %s231_s14, 2304  }
  0x2c   : > { %852 = vsyncadd (%p966_p8), %s231_s14, 4294964992  ;;  %v884_v0 = vmov 0   ;;  %v283_v1 = vld [vmem:[%s1164_s3 + $0x40] sm:$0xff]  ;;  %v273_v3 = vld [vmem:[%s1163_s2 + $0x38] sm:$0xff]  ;;  %v885_v21 = vmov 0.0   ;;  %vm464_vm0 = vcmask 588800  }
  0x2d   : > { %770 = vset.pattern.permute.xlu1 %v884_v0  ;;  %769 = vset.pattern.permute.xlu0 %v884_v0  ;;  %v274_v2 = vld [vmem:[%s1163_s2 + $0x40] sm:$0xff]  ;;  %v272_v4 = vld [vmem:[%s1163_s2 + $0x30] sm:$0xff]  ;;  %v282_v5 = vld [vmem:[%s1164_s3 + $0x38] sm:$0xff]  ;;  %s699_s29 = smul.u32 48, %s1003_s11 }
  0x2e   : > { %410 = vperm.xlu1 %770, %v283_v1   ;;  %347 = vperm.xlu0 %769, %v274_v2   ;;  %v271_v6 = vld [vmem:[%s1163_s2 + $0x28] sm:$0xff]  ;;  %v281_v7 = vld [vmem:[%s1164_s3 + $0x30] sm:$0xff]  ;;  %v270_v8 = vld [vmem:[%s1163_s2 + $0x20] sm:$0xff]  ;;  %s700_s13 = smul.u32 768, %s871_s21  ;;  %s564_s21 = scalar_lea.sflag [#allocation4], %s1003_s11 }
  0x2f   : > { %v280_v9 = vld [vmem:[%s1164_s3 + $0x28] sm:$0xff]  ;;  %v269_v10 = vld [vmem:[%s1163_s2 + $0x18] sm:$0xff]  ;;  %v279_v11 = vld [vmem:[%s1164_s3 + $0x20] sm:$0xff]  ;;  %538 = vmatprep.mubr.f32.mxu0 %v885_v21  ;;  %544 = vmatprep.mubr.f32.mxu1 %v885_v21  ;;  %s260_s10 = scalar_lea.vmem [#allocation5], %s699_s29 }
  0x30   : > { %v268_v12 = vld [vmem:[%s1163_s2 + $0x10] sm:$0xff]  ;;  %v278_v13 = vld [vmem:[%s1164_s3 + $0x18] sm:$0xff]  ;;  %v267_v14 = vld [vmem:[%s1163_s2 + $0x8] sm:$0xff]  ;;  %s579_s9 = sshll.u32 %s260_s10, 4  ;;  %s1113_s15 = scalar_lea.hbm %s1166_s5, %s700_s13  ;;  %s1108_s9 = int_to_ptr.vmem [resolvable:$true] %s579_s9 }
  0x31   : > { %v277_v15 = vld [vmem:[%s1164_s3 + $0x10] sm:$0xff]  ;;  %v266_v16 = vld [vmem:[%s1163_s2] sm:$0xff]  ;;  %v276_v17 = vld [vmem:[%s1164_s3 + $0x8] sm:$0xff]  ;;  %s799_s17 = scalar_lea.vmem %s1108_s9, 768 }
  0x32   : > { %342 = vperm.xlu0 %769, %v273_v3   ;;  %337 = vperm.xlu1 %770, %v272_v4   ;;  %v275_v18 = vld [vmem:[%s1164_s3] sm:$0xff]  ;;  %v285_v20 = vld [vmem:[%s1165_s4 + $0x8] sm:$0xff]  ;;  %v286_v22 = vld [vmem:[%s1165_s4 + $0x10] sm:$0xff]  ;;  %p800_p8 = scmp.ne.s32.totalorder %s1108_s9, %s799_s17 }
  0x33   : > { %v284_v19 = vld [vmem:[%s1165_s4] sm:$0xff]  ;;  %v304_v24 = vld [vmem:[%s1007_s16 + $0x88] sm:$0xff]  ;;  %v302_v32 = vld [vmem:[%s1007_s16 + $0x78] sm:$0xff] }
  0x34   : > { %v303_v23 = vld [vmem:[%s1007_s16 + $0x80] sm:$0xff]  ;;  %v301_v31 = vld [vmem:[%s1007_s16 + $0x70] sm:$0xff]  ;;  %v300_v40 = vld [vmem:[%s1007_s16 + $0x68] sm:$0xff]  ;;  %p801_p12 = pnand %p800_p8, %p970_p9 }
  0x35   : > { %v299_v39 = vld [vmem:[%s1007_s16 + $0x60] sm:$0xff]  ;;  %v297_v49 = vld [vmem:[%s1007_s16 + $0x50] sm:$0xff]  ;;  %v298_v50 = vld [vmem:[%s1007_s16 + $0x58] sm:$0xff] }
  0x36   : > { %405 = vperm.xlu0 %769, %v282_v5   ;;  %332 = vperm.xlu1 %770, %v271_v6   ;;  %v295_v59 = vld [vmem:[%s1007_s16 + $0x40] sm:$0xff]  ;;  %v296_v60 = vld [vmem:[%s1007_s16 + $0x48] sm:$0xff]  ;;  %v293_v5 = vld [vmem:[%s1007_s16 + $0x30] sm:$0xff]  ;;  %p802_p0 = pneg %p801_p12 }
  0x37   : > { %v294_v6 = vld [vmem:[%s1007_s16 + $0x38] sm:$0xff] }
  0x3a   : > { %400 = vperm.xlu0 %769, %v281_v7   ;;  %327 = vperm.xlu1 %770, %v270_v8  }
  0x3e   : > { %395 = vperm.xlu0 %769, %v280_v9   ;;  %322 = vperm.xlu1 %770, %v269_v10  }
  0x42   : > { %390 = vperm.xlu0 %769, %v279_v11   ;;  %317 = vperm.xlu1 %770, %v268_v12  }
  0x46   : > { %385 = vperm.xlu0 %769, %v278_v13   ;;  %312 = vperm.xlu1 %770, %v267_v14  }
  0x4a   : > { %380 = vperm.xlu0 %769, %v277_v15   ;;  %307 = vperm.xlu1 %770, %v266_v16   ;;  %v291_v15 = vld [vmem:[%s1007_s16 + $0x20] sm:$0xff]  ;;  %v292_v16 = vld [vmem:[%s1007_s16 + $0x28] sm:$0xff] }
  0x4e   : > { %375 = vperm.xlu0 %769, %v276_v17   ;;  %370 = vperm.xlu1 %770, %v275_v18  }
  0x52   : > { %451 = vperm.xlu0 %769, %v284_v19   ;;  %456 = vperm.xlu1 %770, %v285_v20  }
  0x56   : > { %461 = vperm.xlu0 %769, %v286_v22  }
  0xa9   : > { %v411_v25 = vpop.permute.xlu1 %410  ;;  %v348_v26 = vpop.permute.xlu0 %347 }
  0xaa   : > { %v366_v27 = vmul.f32 %v348_v26, %v303_v23  ;;  %v367_v28 = vmul.f32 %v348_v26, %v304_v24  ;;  %v289_v26 = vld [vmem:[%s1007_s16 + $0x10] sm:$0xff] }
  0xac   : > { %v430_v29 = vadd.f32 %v411_v25, %v367_v28  ;;  %v429_v30 = vadd.f32 %v411_v25, %v366_v27  ;;  %v290_v27 = vld [vmem:[%s1007_s16 + $0x18] sm:$0xff] }
  0xad   : > { %v343_v33 = vpop.permute.xlu0 %342  ;;  %v338_v34 = vpop.permute.xlu1 %337 }
  0xae   : > { %v448_v35 = vmax.f32 %v430_v29, 0.0  ;;  %v447_v36 = vmax.f32 %v429_v30, 0.0  ;;  %v364_v37 = vmul.f32 %v343_v33, %v301_v31  ;;  %v365_v38 = vmul.f32 %v343_v33, %v302_v32  ;;  %v288_v29 = vld [vmem:[%s1007_s16 + $0x8] sm:$0xff]  ;;  %v287_v33 = vld [vmem:[%s1007_s16] sm:$0xff]  ;;  %s886_s16 = smov [#allocation5]  }
  0xaf   : > { %v362_v45 = vmul.f32 %v338_v34, %v299_v39  ;;  %v363_v46 = vmul.f32 %v338_v34, %v300_v40  ;;  %s803_s24 = sshll.u32 %s886_s16, 4  ;;  %s804_s24 = int_to_ptr.vmem [resolvable:$false] %s803_s24 }
  0xb0   : > { %488 = vmatprep.subr.mxu0 %v448_v35  ;;  %678 = vmatprep.subr.mxu1 %v448_v35  ;;  %s805_s25 = scalar_lea.vmem %s804_s24, 1536  ;;  %p806_p1 = scmp.lt.s32.totalorder %s1108_s9, %s804_s24 }
  0xb1   : > { %v406_v41 = vpop.permute.xlu0 %405  ;;  %v333_v42 = vpop.permute.xlu1 %332  ;;  %489 = vmatpush1.msra.mxu0 %v447_v36  ;;  %687 = vmatpush1.msra.mxu1 %v447_v36  ;;  %p807_p3 = scmp.lt.s32.totalorder %s805_s25, %s799_s17 }
  0xb2   : > { %v427_v43 = vadd.f32 %v406_v41, %v364_v37  ;;  %v428_v44 = vadd.f32 %v406_v41, %v365_v38  ;;  %v360_v55 = vmul.f32 %v333_v42, %v297_v49  ;;  %v361_v56 = vmul.f32 %v333_v42, %v298_v50  ;;  %v263_v50 = vld [vmem:[%s1162_s1] sm:$0xff] }
  0xb3   : > { %p808_p5 = por %p807_p3, %p806_p1 }
  0xb4   : > { %v445_v47 = vmax.f32 %v427_v43, 0.0  ;;  %v446_v48 = vmax.f32 %v428_v44, 0.0 }
  0xb5   : > { %v401_v51 = vpop.permute.xlu0 %400  ;;  %v328_v52 = vpop.permute.xlu1 %327  ;;  %p809_p6 = pnand %p808_p5, %p802_p0 }
  0xb6   : > { %v425_v53 = vadd.f32 %v401_v51, %v362_v45  ;;  %v426_v54 = vadd.f32 %v401_v51, %v363_v46  ;;  %490 = vmatprep.subr.mxu0 %v446_v48  ;;  %679 = vmatprep.subr.mxu1 %v446_v48  ;;  %v358_v1 = vmul.f32 %v328_v52, %v295_v59  ;;  %v264_v51 = vld [vmem:[%s1162_s1 + $0x8] sm:$0xff] }
  0xb7   : > { %491 = vmatpush1.msra.mxu0 %v445_v47  ;;  %688 = vmatpush1.msra.mxu1 %v445_v47  ;;  %v359_v2 = vmul.f32 %v328_v52, %v296_v60  ;;  %v265_v52 = vld [vmem:[%s1162_s1 + $0x10] sm:$0xff] }
  0xb8   : > { %v443_v57 = vmax.f32 %v425_v53, 0.0  ;;  %v444_v58 = vmax.f32 %v426_v54, 0.0 }
  0xb9   : > { %v396_v61 = vpop.permute.xlu0 %395  ;;  %v323_v62 = vpop.permute.xlu1 %322 }
  0xba   : > { %v423_v63 = vadd.f32 %v396_v61, %v360_v55  ;;  %v424_v0 = vadd.f32 %v396_v61, %v361_v56  ;;  %492 = vmatprep.subr.mxu0 %v444_v58  ;;  %680 = vmatprep.subr.mxu1 %v444_v58  ;;  %v356_v11 = vmul.f32 %v323_v62, %v293_v5 }
  0xbb   : > { %493 = vmatpush1.msra.mxu0 %v443_v57  ;;  %689 = vmatpush1.msra.mxu1 %v443_v57  ;;  %v357_v12 = vmul.f32 %v323_v62, %v294_v6 }
  0xbc   : > { %v441_v3 = vmax.f32 %v423_v63, 0.0  ;;  %v442_v4 = vmax.f32 %v424_v0, 0.0 }
  0xbd   : > { %v391_v7 = vpop.permute.xlu0 %390  ;;  %v318_v8 = vpop.permute.xlu1 %317 }
  0xbe   : > { %v421_v9 = vadd.f32 %v391_v7, %v358_v1  ;;  %v422_v10 = vadd.f32 %v391_v7, %v359_v2  ;;  %494 = vmatprep.subr.mxu0 %v442_v4  ;;  %681 = vmatprep.subr.mxu1 %v442_v4  ;;  %v354_v22 = vmul.f32 %v318_v8, %v291_v15 }
  0xbf   : > { %495 = vmatpush1.msra.mxu0 %v441_v3  ;;  %690 = vmatpush1.msra.mxu1 %v441_v3  ;;  %v355_v23 = vmul.f32 %v318_v8, %v292_v16 }
  0xc0   : > { %v439_v13 = vmax.f32 %v421_v9, 0.0  ;;  %v440_v14 = vmax.f32 %v422_v10, 0.0 }
  0xc1   : > { %v386_v17 = vpop.permute.xlu0 %385  ;;  %v313_v18 = vpop.permute.xlu1 %312 }
  0xc2   : > { %v419_v19 = vadd.f32 %v386_v17, %v356_v11  ;;  %v420_v20 = vadd.f32 %v386_v17, %v357_v12  ;;  %496 = vmatprep.subr.mxu0 %v440_v14  ;;  %682 = vmatprep.subr.mxu1 %v440_v14  ;;  %v352_v34 = vmul.f32 %v313_v18, %v289_v26 }
  0xc3   : > { %497 = vmatpush1.msra.mxu0 %v439_v13  ;;  %691 = vmatpush1.msra.mxu1 %v439_v13  ;;  %v353_v35 = vmul.f32 %v313_v18, %v290_v27 }
  0xc4   : > { %v437_v24 = vmax.f32 %v419_v19, 0.0  ;;  %v438_v25 = vmax.f32 %v420_v20, 0.0 }
  0xc5   : > { %v381_v28 = vpop.permute.xlu0 %380  ;;  %v308_v30 = vpop.permute.xlu1 %307 }
  0xc6   : > { %v417_v31 = vadd.f32 %v381_v28, %v354_v22  ;;  %v418_v32 = vadd.f32 %v381_v28, %v355_v23  ;;  %498 = vmatprep.subr.mxu0 %v438_v25  ;;  %683 = vmatprep.subr.mxu1 %v438_v25  ;;  %v351_v38 = vmul.f32 %v308_v30, %v288_v29 }
  0xc7   : > { %499 = vmatpush1.msra.mxu0 %v437_v24  ;;  %692 = vmatpush1.msra.mxu1 %v437_v24  ;;  %v350_v39 = vmul.f32 %v308_v30, %v287_v33 }
  0xc8   : > { %v435_v36 = vmax.f32 %v417_v31, 0.0  ;;  %v436_v37 = vmax.f32 %v418_v32, 0.0 }
  0xc9   : > { %v376_v40 = vpop.permute.xlu0 %375  ;;  %v371_v41 = vpop.permute.xlu1 %370 }
  0xca   : > { %v415_v42 = vadd.f32 %v376_v40, %v352_v34  ;;  %v416_v43 = vadd.f32 %v376_v40, %v353_v35  ;;  %v414_v44 = vadd.f32 %v371_v41, %v351_v38  ;;  %500 = vmatprep.subr.mxu0 %v436_v37  ;;  %v413_v45 = vadd.f32 %v371_v41, %v350_v39 }
  0xcb   : > { %684 = vmatprep.subr.mxu1 %v436_v37  ;;  %501 = vmatpush1.msra.mxu0 %v435_v36 }
  0xcc   : > { %v433_v46 = vmax.f32 %v415_v42, 0.0  ;;  %v434_v47 = vmax.f32 %v416_v43, 0.0  ;;  %693 = vmatpush1.msra.mxu1 %v435_v36  ;;  %v432_v48 = vmax.f32 %v414_v44, 0.0  ;;  %v431_v49 = vmax.f32 %v413_v45, 0.0 }
  0xcd   : > { %v452_v53 = vpop.permute.xlu0 %451  ;;  %v457_v54 = vpop.permute.xlu1 %456 }
  0xce   : > { %502 = vmatprep.subr.mxu0 %v434_v47  ;;  %685 = vmatprep.subr.mxu1 %v434_v47 }
  0xcf   : > { %503 = vmatpush1.msra.mxu0 %v433_v46  ;;  %694 = vmatpush1.msra.mxu1 %v433_v46 }
  0xd0   : > { %504 = vmatprep.subr.mxu0 %v432_v48  ;;  %686 = vmatprep.subr.mxu1 %v432_v48 }
  0xd1   : > { %505 = vmatpush1.msra.mxu0 %v431_v49  ;;  %695 = vmatpush1.msra.mxu1 %v431_v49  ;;  %v462_v62 = vpop.permute.xlu0 %461 }
  0xd2   : > { %672 = vmatmul.mubr.msk.f32.vlgmr.msra.gmra.mxu0 %vm464_vm0, %v263_v50  ;;  %673 = vmatmul.mubr.msk.f32.vlgmr.msra.gmra.mxu1 %vm464_vm0, %v264_v51 }
  0xd3   : > { %550 = vmatprep.mubr.f32.mxu1 %v885_v21 }
  0xd6   : > { %674 = vmatmul.mubr.msk.f32.gmra.mxu1 %vm464_vm0, %v265_v52 }
 0x192   : > { %v540_v55 = vpop.f32.mrf.mxu0  ;;  %v546_v56 = vpop.f32.mrf.mxu1 }
 0x193   : > { %v541_v57 = vadd.f32 %v540_v55, %v452_v53  ;;  %v547_v58 = vadd.f32 %v546_v56, %v457_v54 }
 0x194   : > { %v542_v59 = vpop.f32.mrf.mxu0  ;;  %v548_v60 = vpop.f32.mrf.mxu1 }
 0x195   : > { %557 = vst [vmem:[%s260_s10] sm:$0xff] %v541_v57  ;;  %559 = vst [vmem:[%s260_s10 + $0x10] sm:$0xff] %v547_v58  ;;  %v543_v21 = vadd.f32 %v542_v59, %v452_v53  ;;  %v549_v61 = vadd.f32 %v548_v60, %v457_v54 }
 0x196   : > { %v552_v63 = vpop.f32.mrf.mxu1 }
 0x197   : > { %558 = vst [vmem:[%s260_s10 + $0x8] sm:$0xff] %v543_v21  ;;  %560 = vst [vmem:[%s260_s10 + $0x18] sm:$0xff] %v549_v61  ;;  %v553_v0 = vadd.f32 %v552_v63, %v462_v62 }
 0x198   : > { %v554_v1 = vpop.f32.mrf.mxu1 }
 0x199   : > { %561 = vst [vmem:[%s260_s10 + $0x20] sm:$0xff] %v553_v0  ;;  %v555_v2 = vadd.f32 %v554_v1, %v462_v62 }
 0x19b   : > { %562 = vst [vmem:[%s260_s10 + $0x28] sm:$0xff] %v555_v2 }
 0x19c   : > { %812 = shalt.err (!%p809_p6)
}
 0x19d   : > { %s813_s27 = scalar_lea.hbm %s1113_s15, 768  ;;  %s817_s29 = scalar_lea.hbm %s1166_s5, 1536 }
 0x19e   : > { %p814_p4 = scmp.ne.s32.totalorder %s1113_s15, %s813_s27  ;;  %p818_p13 = scmp.lt.s32.totalorder %s1113_s15, %s1166_s5 }
 0x19f   : > { %p819_p2 = scmp.lt.s32.totalorder %s817_s29, %s813_s27 }
 0x1a0   : > { %p815_p7 = pnand %p814_p4, %p970_p9 }
 0x1a1   : > { %p820_p8 = por %p819_p2, %p818_p13 }
 0x1a2   : > { %p816_p10 = pneg %p815_p7 }
 0x1a4   : > { %p821_p12 = pnand %p820_p8, %p816_p10 }
 0x1a6   : > { %824 = shalt.err (!%p821_p12)
}
 0x1a7   : > { %s887_s14 = smov 256   ;;  %s888_s12 = smov 16  }
 0x1a8   : > { %703 = dma.vmem_to_hbm [thread:$0]  (%p970_p9), %s1108_s9, 768, %s1113_s15, %s564_s21, %s887_s14, %s887_s14, %s888_s12  }
 0x1a9 PF: > { %s594_s17 = sand.u32 1, %s859_s18   ;;  %p1172_p0 = scmp.ge.s32.totalorder %s879_s23, 2 }
 0x1aa   : > { %s595_s16 = scalar_lea.sflag [#allocation4], %s594_s17 }
 0x1ab   : > { %p710_p1 = pnand %p1172_p0, %p977_p11 }
 0x1ad   : > { %p711_p3 = pneg %p710_p1 }
 0x1af   : > { %854 = dma.done.wait (%p711_p3), %s595_s16, 768  }
 0x1b0   : > { %856 = vsyncadd (%p711_p3), %s595_s16, 4294966528  ;;  %s21_s23 = sadd.s32 1, %s879_s23   ;;  %s1173_s18 = smov %s863_s19 }
 0x1b1   : > { %p18_p5 = scmp.ge.s32.totalorder %s21_s23, 4   ;;  %s1174_s19 = smov %s867_s20 }
 0x1b2   : > { %s1175_s20 = smov %s975_s7  ;;  %s1176_s21 = smov %s875_s22 }
 0x1b3   : > { %s1177_s22 = smov %s1179_s26  ;;  %20 = sbr.rel (!%p18_p5) target bundleno = 6 (0x6), region = 85 }
 0x1b8   :  { %600 = vsyncpa [#allocation3], 1 }
 0x1b9   :  { %602 = vsyncpa [#allocation3 + $0x1], 1 }
 0x1ba   :  { %603 = vsyncpa [#allocation4], 1 }
 0x1bb   :  { %605 = vsyncpa [#allocation4 + $0x1], 1 }

</bundles_post_ra>
